<compile_context>
chip_gen: v5e
topology: v5e:2x2
jax: 0.10.0
libtpu: 0.0.40
codegen_flags: <defaults>
</compile_context>

<pallas_src>
import jax
import jax.numpy as jnp
from jax.experimental import pallas as pl
from jax.experimental.pallas import tpu as pltpu


def _channel_attention_kernel(x_ref, w1_ref, b1_ref, w2_ref, b2_ref, o_ref):
    # x_ref / o_ref : (KB, C, HW) in the input dtype
    # w1_ref: (C, C8)   b1_ref: (1, C8)
    # w2_ref: (C8, C)   b2_ref: (1, C)
    x = x_ref[...]                                   # native dtype, no full upcast
    kb, c, hw = x.shape

    # --- global avg / max pooling over the spatial (lane) axis, f32 stats ---
    avg = jnp.sum(x, axis=-1, dtype=jnp.float32) * (1.0 / hw)    # (KB, C)
    mx = jnp.max(x, axis=-1).astype(jnp.float32)                 # (KB, C)

    # Stack the two branches on the sublane axis -> one wide MLP RHS per step.
    stats = jnp.concatenate([avg, mx], axis=0)                   # (2*KB, C)

    # --- shared 2-layer MLP, exactly two MXU matmuls for all KB batches -----
    h = jnp.dot(stats, w1_ref[...], preferred_element_type=jnp.float32)
    h = jnp.maximum(h + b1_ref[...], 0.0)                        # (2*KB, C8) ReLU
    lg = (jnp.dot(h, w2_ref[...], preferred_element_type=jnp.float32)
          + b2_ref[...])                                         # (2*KB, C)

    # avg branch + max branch (biases counted twice, matching the PyTorch
    # module: avg_fc + max_fc each carry fc1/fc2 biases).
    logits = lg[:kb, :] + lg[kb:, :]                             # (KB, C)
    gate = 1.0 / (1.0 + jnp.exp(-logits))                        # sigmoid, f32

    # --- gating multiply: lane-broadcast of the per-(batch, channel) gate ---
    # (gate cast to x.dtype keeps the big tile in the input dtype; tiny
    #  precision loss for bf16 callers, exact for f32.)
    o_ref[...] = x * gate[:, :, None].astype(x.dtype)


def _pick_kb(batch, per_batch_bytes):
    """Batches folded per grid step: ~1 MiB blocks, v7x-safe cap, grid >= 2."""
    target = 1 << 20          # ~1 MiB blocks sit near the HBM roofline
    cap = 6 << 20             # keeps 2x(in)+2x(out) double-buffers < ~28 MiB (v7x)
    kb_cap = max(1, cap // max(1, per_batch_bytes))
    if batch >= 2:
        kb_cap = min(kb_cap, batch // 2)   # keep >= 2 grid steps for 2-TC v7x
    kb_cap = max(1, min(kb_cap, batch))
    best = 1
    for kb in range(1, kb_cap + 1):        # divisors of batch only -> exact grid
        if batch % kb == 0:
            best = kb
            if kb * per_batch_bytes >= target:
                break
    return best


def channel_attention(x_nchw, w1, b1, w2, b2):
    """x_nchw: (B, C, H, W); w1: (C, C//8); b1: (C//8,); w2: (C//8, C); b2: (C,)."""
    B, C, H, W = x_nchw.shape
    HW = H * W
    C8 = w1.shape[1]
    # Tiling assumes (8, 128)-aligned slabs; true for this module's shapes.
    assert C % 8 == 0 and HW % 128 == 0, "expect C % 8 == 0 and H*W % 128 == 0"

    itemsize = x_nchw.dtype.itemsize
    per_batch_bytes = C * HW * itemsize
    KB = _pick_kb(B, per_batch_bytes)
    grid_len = B // KB
    block_bytes = KB * per_batch_bytes

    x3 = x_nchw.reshape(B, C, HW)
    b1r = b1.reshape(1, C8)
    b2r = b2.reshape(1, C)

    # Memory-bound: 2 * B*C*HW bytes of HBM traffic dominates.
    cost = pl.CostEstimate(
        flops=int(3 * B * C * HW + 8 * B * C * C8 + 4 * B * C),
        transcendentals=int(B * C),
        bytes_accessed=int(2 * B * C * HW * itemsize),
    )

    # 2x(in)+2x(out) double-buffered blocks + slack for weights/stats/scratch.
    vmem_limit = int(min(max(4 * block_bytes + (4 << 20), 16 << 20), 100 << 20))

    grid_spec = pltpu.PrefetchScalarGridSpec(
        num_scalar_prefetch=0,
        grid=(grid_len,),
        in_specs=[
            pl.BlockSpec((KB, C, HW), lambda i: (i, 0, 0)),  # x: KB batches / step
            pl.BlockSpec((C, C8), lambda i: (0, 0)),         # w1 (resident)
            pl.BlockSpec((1, C8), lambda i: (0, 0)),         # b1
            pl.BlockSpec((C8, C), lambda i: (0, 0)),         # w2
            pl.BlockSpec((1, C), lambda i: (0, 0)),          # b2
        ],
        out_specs=pl.BlockSpec((KB, C, HW), lambda i: (i, 0, 0)),
    )

    out3 = pl.pallas_call(
        _channel_attention_kernel,
        out_shape=jax.ShapeDtypeStruct((B, C, HW), x_nchw.dtype),
        grid_spec=grid_spec,
        compiler_params=pltpu.CompilerParams(
            dimension_semantics=("parallel",),
            vmem_limit_bytes=vmem_limit,
        ),
        cost_estimate=cost,
    )(x3, w1, b1r, w2, b2r)

    return out3.reshape(B, C, H, W)


def _reference(x_nchw, w1, b1, w2, b2):
    # Pure-JAX reference matching the PyTorch forward.
    xf = x_nchw.astype(jnp.float32)
    avg = xf.mean(axis=(2, 3))            # (B, C)
    mx = xf.max(axis=(2, 3))              # (B, C)

    def mlp(v):
        h = jnp.maximum(v @ w1 + b1, 0.0)
        return h @ w2 + b2

    gate = jax.nn.sigmoid(mlp(avg) + mlp(mx))
    return xf * gate[:, :, None, None]


if __name__ == "__main__":
    # in_channels must be a multiple of 8 (module uses in_channels // 8).
    B, C, H, W = 2, 32, 16, 16
    C8 = C // 8

    key = jax.random.PRNGKey(0)
    kx, kw1, kb1, kw2, kb2 = jax.random.split(key, 5)

    x = jax.random.normal(kx, (B, C, H, W), dtype=jnp.float32)

    # Linear weights stored transposed (in, out) so v @ W == PyTorch v @ weight.T.
    w1 = jax.random.normal(kw1, (C, C8), dtype=jnp.float32) * (1.0 / jnp.sqrt(C))
    b1 = jax.random.normal(kb1, (C8,), dtype=jnp.float32) * 0.1
    w2 = jax.random.normal(kw2, (C8, C), dtype=jnp.float32) * (1.0 / jnp.sqrt(C8))
    b2 = jax.random.normal(kb2, (C,), dtype=jnp.float32) * 0.1

    out = jax.block_until_ready(channel_attention(x, w1, b1, w2, b2))

    ref = _reference(x, w1, b1, w2, b2)
    assert out.shape == (B, C, H, W)
    assert jnp.allclose(out, ref, atol=1e-5, rtol=1e-5), "mismatch vs reference"

    print("KERNEL_OK")
</pallas_src>

<mosaic_0001>
module attributes {stable_mosaic.version = 11 : i64} {
  func.func @_channel_attention_kernel(%arg0: i32, %arg1: memref<1x32x256xf32, #tpu.memory_space<vmem>>, %arg2: memref<32x4xf32, #tpu.memory_space<vmem>>, %arg3: memref<1x4xf32, #tpu.memory_space<vmem>>, %arg4: memref<4x32xf32, #tpu.memory_space<vmem>>, %arg5: memref<1x32xf32, #tpu.memory_space<vmem>>, %arg6: memref<1x32x256xf32, #tpu.memory_space<vmem>>) attributes {dimension_semantics = [#tpu.dimension_semantics<parallel>], iteration_bounds = array<i64: 2>, scalar_prefetch = 0 : i64, scratch_operands = 0 : i64, tpu.core_type = #tpu.core_type<tc>, window_params = [{transform_indices = @transform_0, window_bounds = array<i64: 1, 32, 256>}, {pipeline_mode = #tpu.pipeline_mode<synchronous>, transform_indices = @transform_1, window_bounds = array<i64: 32, 4>}, {pipeline_mode = #tpu.pipeline_mode<synchronous>, transform_indices = @transform_2, window_bounds = array<i64: 1, 4>}, {pipeline_mode = #tpu.pipeline_mode<synchronous>, transform_indices = @transform_3, window_bounds = array<i64: 4, 32>}, {pipeline_mode = #tpu.pipeline_mode<synchronous>, transform_indices = @transform_4, window_bounds = array<i64: 1, 32>}, {transform_indices = @transform_5, window_bounds = array<i64: 1, 32, 256>}]} {
    %c0 = arith.constant 0 : index
    %c0_0 = arith.constant 0 : index
    %c0_1 = arith.constant 0 : index
    %0 = vector.load %arg1[%c0, %c0_0, %c0_1] : memref<1x32x256xf32, #tpu.memory_space<vmem>>, vector<1x32x256xf32>
    %cst = arith.constant dense<0.000000e+00> : vector<1x32xf32>
    %1 = vector.multi_reduction <add>, %0, %cst [2] : vector<1x32x256xf32> to vector<1x32xf32>
    %cst_2 = arith.constant 3.906250e-03 : f32
    %2 = vector.broadcast %cst_2 : f32 to vector<1x32xf32>
    %3 = arith.mulf %1, %2 : vector<1x32xf32>
    %cst_3 = arith.constant dense<0xFF800000> : vector<1x32xf32>
    %4 = vector.multi_reduction <maximumf>, %0, %cst_3 [2] : vector<1x32x256xf32> to vector<1x32xf32>
    %5 = tpu.concatenate %3, %4 in 0 : vector<1x32xf32>, vector<1x32xf32> -> vector<2x32xf32>
    %c0_4 = arith.constant 0 : index
    %c0_5 = arith.constant 0 : index
    %6 = vector.load %arg2[%c0_4, %c0_5] : memref<32x4xf32, #tpu.memory_space<vmem>>, vector<32x4xf32>
    %cst_6 = arith.constant dense<0.000000e+00> : vector<2x4xf32>
    %7 = tpu.matmul %5, %6, %cst_6 {dimension_numbers = #tpu.dot_dimension_numbers<[1], [0], [0], [1], [0, 0, 1, 1], [], []>} : vector<2x32xf32>, vector<32x4xf32>, vector<2x4xf32> -> vector<2x4xf32>
    %c0_7 = arith.constant 0 : index
    %c0_8 = arith.constant 0 : index
    %8 = vector.load %arg3[%c0_7, %c0_8] : memref<1x4xf32, #tpu.memory_space<vmem>>, vector<1x4xf32>
    %9 = vector.broadcast %8 : vector<1x4xf32> to vector<2x4xf32>
    %10 = arith.addf %7, %9 : vector<2x4xf32>
    %cst_9 = arith.constant 0.000000e+00 : f32
    %11 = vector.broadcast %cst_9 : f32 to vector<2x4xf32>
    %12 = arith.maximumf %10, %11 : vector<2x4xf32>
    %c0_10 = arith.constant 0 : index
    %c0_11 = arith.constant 0 : index
    %13 = vector.load %arg4[%c0_10, %c0_11] : memref<4x32xf32, #tpu.memory_space<vmem>>, vector<4x32xf32>
    %cst_12 = arith.constant dense<0.000000e+00> : vector<2x32xf32>
    %14 = tpu.matmul %12, %13, %cst_12 {dimension_numbers = #tpu.dot_dimension_numbers<[1], [0], [0], [1], [0, 0, 1, 1], [], []>} : vector<2x4xf32>, vector<4x32xf32>, vector<2x32xf32> -> vector<2x32xf32>
    %c0_13 = arith.constant 0 : index
    %c0_14 = arith.constant 0 : index
    %15 = vector.load %arg5[%c0_13, %c0_14] : memref<1x32xf32, #tpu.memory_space<vmem>>, vector<1x32xf32>
    %16 = vector.broadcast %15 : vector<1x32xf32> to vector<2x32xf32>
    %17 = arith.addf %14, %16 : vector<2x32xf32>
    %18 = vector.extract_strided_slice %17 {offsets = [0, 0], sizes = [1, 32], strides = [1, 1]} : vector<2x32xf32> to vector<1x32xf32>
    %19 = vector.extract_strided_slice %17 {offsets = [1, 0], sizes = [1, 32], strides = [1, 1]} : vector<2x32xf32> to vector<1x32xf32>
    %20 = arith.addf %18, %19 : vector<1x32xf32>
    %cst_15 = arith.constant 0.000000e+00 : f32
    %21 = vector.broadcast %cst_15 : f32 to vector<1x32xf32>
    %22 = arith.subf %21, %20 : vector<1x32xf32>
    %23 = math.exp %22 : vector<1x32xf32>
    %cst_16 = arith.constant 1.000000e+00 : f32
    %24 = vector.broadcast %cst_16 : f32 to vector<1x32xf32>
    %25 = arith.addf %24, %23 : vector<1x32xf32>
    %cst_17 = arith.constant 1.000000e+00 : f32
    %26 = vector.broadcast %cst_17 : f32 to vector<1x32xf32>
    %27 = arith.divf %26, %25 : vector<1x32xf32>
    %28 = vector.shape_cast %27 : vector<1x32xf32> to vector<1x32x1xf32>
    %29 = vector.broadcast %28 : vector<1x32x1xf32> to vector<1x32x256xf32>
    %30 = arith.mulf %0, %29 : vector<1x32x256xf32>
    %c0_18 = arith.constant 0 : index
    %c0_19 = arith.constant 0 : index
    %c0_20 = arith.constant 0 : index
    %31 = vector.load %arg6[%c0_18, %c0_19, %c0_20] : memref<1x32x256xf32, #tpu.memory_space<vmem>>, vector<1x32x256xf32>
    tpu.vector_store %arg6[%c0_18, %c0_19, %c0_20], %30 {strides = array<i32>} : memref<1x32x256xf32, #tpu.memory_space<vmem>>, vector<1x32x256xf32>,
    return
  }
  func.func @transform_0(%arg0: i32) -> (i32, i32, i32) {
    %c0_i32 = arith.constant 0 : i32
    %c0_i32_0 = arith.constant 0 : i32
    %c0_i32_1 = arith.constant 0 : i32
    return %arg0, %c0_i32, %c0_i32_0 : i32, i32, i32
  }
  func.func @transform_1(%arg0: i32) -> (i32, i32) {
    %c0_i32 = arith.constant 0 : i32
    %c0_i32_0 = arith.constant 0 : i32
    %c0_i32_1 = arith.constant 0 : i32
    return %c0_i32, %c0_i32_0 : i32, i32
  }
  func.func @transform_2(%arg0: i32) -> (i32, i32) {
    %c0_i32 = arith.constant 0 : i32
    %c0_i32_0 = arith.constant 0 : i32
    %c0_i32_1 = arith.constant 0 : i32
    return %c0_i32, %c0_i32_0 : i32, i32
  }
  func.func @transform_3(%arg0: i32) -> (i32, i32) {
    %c0_i32 = arith.constant 0 : i32
    %c0_i32_0 = arith.constant 0 : i32
    %c0_i32_1 = arith.constant 0 : i32
    return %c0_i32, %c0_i32_0 : i32, i32
  }
  func.func @transform_4(%arg0: i32) -> (i32, i32) {
    %c0_i32 = arith.constant 0 : i32
    %c0_i32_0 = arith.constant 0 : i32
    %c0_i32_1 = arith.constant 0 : i32
    return %c0_i32, %c0_i32_0 : i32, i32
  }
  func.func @transform_5(%arg0: i32) -> (i32, i32, i32) {
    %c0_i32 = arith.constant 0 : i32
    %c0_i32_0 = arith.constant 0 : i32
    %c0_i32_1 = arith.constant 0 : i32
    return %arg0, %c0_i32, %c0_i32_0 : i32, i32, i32
  }
}

</mosaic_0001>

<bundles_post_ra>
// kernel: tpu_custom_call.1
= control target key start
LH: loop header
LB: loop body
LE: loop exit
PB: predicated region body
PF: predicated region fallthrough
CT: control target
= control target key end

     0   :  { %10 = vsyncpa [#allocation3], 0  ;;  %s938_s0 = inlined_call_operand.hbm [shape: f32[2,32,256], index: 0, kind: input, shape index: {}]   ;;  %s939_s1 = inlined_call_operand.vmem [shape: f32[32,4], index: 1, kind: input, shape index: {}]   ;;  %s940_s2 = inlined_call_operand.vmem [shape: f32[1,4], index: 2, kind: input, shape index: {}]   ;;  %s941_s3 = inlined_call_operand.vmem [shape: f32[4,32], index: 3, kind: input, shape index: {}]   ;;  %s942_s4 = inlined_call_operand.vmem [shape: f32[1,32], index: 4, kind: input, shape index: {}]   ;;  %s943_s5 = inlined_call_operand.hbm [shape: f32[2,32,256], index: 5, kind: output, shape index: {}]  }
   0x1   :  { %12 = vsyncpa [#allocation3 + $0x1], 0 }
   0x2   :  { %13 = vsyncpa [#allocation4], 0 }
   0x3   :  { %15 = vsyncpa [#allocation4 + $0x1], 0  ;;  %s746_s18 = smov 0   ;;  %s748_s19 = smov 0  }
   0x4   :  { %s750_s20 = smov 0   ;;  %s752_s21 = smov 0  }
   0x5 LB: > { %s767_s22 = sadd.s32 4294967295, %s710_s21   ;;  %s534_s23 = sadd.s32 4294967294, %s710_s21   ;;  %s710_s21 = sphi %s752_s21, %s953_s21   ;;  %s706_s20 = sphi %s750_s20, %s952_s20   ;;  %s702_s19 = sphi %s748_s19, %s951_s19   ;;  %s698_s18 = sphi %s746_s18, %s950_s18  }
   0x6   : > { %s771_s24 = sadd.s32 1, %s710_s21   ;;  %s28_s25 = sadd.s32 1, %s706_s20 }
   0x7   : > { %s25_s26 = ssub.s32 %s710_s21, %s771_s24  ;;  %p35_p0 = scmp.ne.s32.totalorder %s706_s20, %s702_s19 }
   0x8   : > { %p26_p1 = scmp.eq.s32.totalorder %s25_s26, 0  ;;  %p36_p2 = scmp.eq.s32.totalorder %s710_s21, 0 }
   0x9   : > { %p41_p3 = scmp.ne.s32.totalorder %s702_s19, %s698_s18  ;;  %p42_p4 = scmp.eq.s32.totalorder %s767_s22, 0 }
   0xa   : > { %s783_s27 = scalar_select %p26_p1, %s706_s20, %s28_s25  }
   0xb   : > { %p785_p5 = por %p36_p2, %p35_p0  ;;  %p789_p6 = por %p42_p4, %p41_p3 }
   0xc   : > { %p149_p7 = scmp.eq.s32.totalorder %s767_s22, 1  ;;  %p155_p8 = scmp.eq.s32.totalorder %s534_s23, 1 }
   0xd   : > { %p565_p10 = scmp.lt.s32.totalorder %s710_s21, 2  ;;  %s187_s7 = sand.u32 1, %s706_s20  }
   0xe   : > { %p796_p11 = por %p149_p7, %p35_p0  ;;  %p800_p12 = por %p155_p8, %p41_p3 }
   0xf   : > { %s551_s8 = sshll.u32 %s710_s21, 6  ;;  %s537_s9 = sshll.u32 %s187_s7, 6 }
  0x10   : > { %s196_s12 = scalar_lea.hbm %s938_s0, %s551_s8  ;;  %s191_s14 = scalar_lea.vmem [#allocation2], %s537_s9 }
  0x11   : > { %s197_s13 = sshll.u32 %s196_s12, 4  ;;  %s199_s15 = sshll.u32 %s191_s14, 4  ;;  %s198_s13 = int_to_ptr.hbm [resolvable:$true] %s197_s13  ;;  %s200_s15 = int_to_ptr.vmem [resolvable:$true] %s199_s15 }
  0x12   : > { %p811_p13 = pnand %p565_p10, %p785_p5  ;;  %p540_p0 = scmp.ge.s32.totalorder %s710_s21, 1 }
  0x13   : > { %p207_p1 = scmp.lt.s32.totalorder %s710_s21, 3  ;;  %s188_s17 = scalar_lea.sflag [#allocation3], %s187_s7 }
  0x14   : > { %s614_s23 = sshra.s32 %s198_s13, 4  ;;  %p618_p3 = pneg %p811_p13  ;;  %s615_s23 = int_to_ptr.hbm [resolvable:$true] %s614_s23 }
  0x15   : > { %s616_s25 = scalar_lea.hbm %s615_s23, 64  ;;  %s621_s28 = scalar_lea.hbm %s938_s0, 128 }
  0x16   : > { %p617_p2 = scmp.ne.s32.totalorder %s615_s23, %s616_s25  ;;  %p622_p5 = scmp.lt.s32.totalorder %s615_s23, %s938_s0 }
  0x17   : > { %p623_p8 = scmp.lt.s32.totalorder %s621_s28, %s616_s25 }
  0x18   : > { %p619_p4 = pnand %p618_p3, %p617_p2 }
  0x19   : > { %p624_p10 = por %p623_p8, %p622_p5 }
  0x1a   : > { %p620_p7 = pneg %p619_p4 }
  0x1c   : > { %p625_p9 = pnand %p624_p10, %p620_p7 }
  0x1e   : > { %628 = shalt.err (!%p625_p9)
}
  0x1f   : > { %s712_s7 = smov 256   ;;  %s713_s11 = smov 16  }
  0x20   : > { %560 = dma.hbm_to_vmem [thread:$0]  (!%p811_p13), %s198_s13, 1024, %s200_s15, %s188_s17, %s712_s7, %s712_s7, %s713_s11  }
  0x21   : > { %p208_p2 = pnand %p540_p0, %p207_p1 }
  0x22   : > { %s832_s12 = sand.u32 (!%p208_p2), 1, %s702_s19  }
  0x23   : > { %211 = sbr.rel (%p208_p2) target bundleno = 599 (0x257), region = 40  ;;  %s541_s14 = sshll.u32 (!%p208_p2), %s832_s12, 6 }
  0x24   : > { %s214_s23 = scalar_lea.sflag (!%p208_p2), [#allocation3], %s832_s12  ;;  %s217_s25 = scalar_lea.vmem (!%p208_p2), [#allocation2], %s541_s14 }
  0x28   : > { %689 = dma.done.wait (%p789_p6), %s214_s23, 1024  }
  0x29   : > { %691 = vsyncadd (%p789_p6), %s214_s23, 4294966272  ;;  %v842_v0 = vld [vmem:[%s217_s25] sm:$0xff]  ;;  %v844_v1 = vld [vmem:[%s217_s25 + $0x8] sm:$0xff]  ;;  %v285_v23 = vlaneseq  ;;  %vm290_vm0 = vcmask 130112   ;;  %vm294_vm1 = vcmask 195712   ;;  %vm298_vm2 = vcmask 261312  }
  0x2a   : > { %v846_v2 = vld [vmem:[%s217_s25 + $0x20] sm:$0xff]  ;;  %v269_v3 = vmax.f32 %v842_v0, %v844_v1  ;;  %v253_v4 = vadd.f32 %v844_v1, %v842_v0  ;;  %v852_v5 = vld [vmem:[%s217_s25 + $0x28] sm:$0xff]  ;;  %v856_v7 = vld [vmem:[%s217_s25 + $0x10] sm:$0xff]  ;;  %vm313_vm3 = vcmask 1040384   ;;  %vm323_vm4 = vcmask 261120   ;;  %s244_s29 = scalar_lea.vmem [#allocation5], %s541_s14 }
  0x2b   : > { %v259_v6 = vadd.f32 %v852_v5, %v846_v2  ;;  %v858_v8 = vld [vmem:[%s217_s25 + $0x18] sm:$0xff]  ;;  %v860_v9 = vld [vmem:[%s217_s25 + $0x30] sm:$0xff]  ;;  %v275_v14 = vmax.f32 %v846_v2, %v852_v5  ;;  %v316_v18 = vld [vmem:[%s939_s1 + $0x8] sm:$0xff]  ;;  %v286_v24 = vand.u32 127, %v285_v23  ;;  %vm357_vm5 = vcmask 1043456   ;;  %s552_s13 = sshll.u32 %s767_s22, 6 }
  0x2c   : > { %270 = vmax.xlane.f32.xlu2 %v269_v3  ;;  %254 = vadd.xlane.f32.xlu0 %v253_v4  ;;  %v862_v10 = vld [vmem:[%s217_s25 + $0x38] sm:$0xff]  ;;  %v272_v11 = vmax.f32 %v856_v7, %v858_v8  ;;  %v256_v12 = vadd.f32 %v858_v8, %v856_v7  ;;  %v317_v17 = vld [vmem:[%s939_s1 + $0x10] sm:$0xff]  ;;  %v315_v19 = vld [vmem:[%s939_s1] sm:$0xff]  ;;  %vm353_vm6 = vcmask 31744   ;;  %v406_v57 = vshrl.u32 %v285_v23, 7  ;;  %s457_s17 = scalar_lea.hbm %s943_s5, %s552_s13  ;;  %s458_s26 = sshll.u32 %s244_s29, 4  ;;  %s459_s26 = int_to_ptr.vmem [resolvable:$true] %s458_s26 }
  0x2d   : > { %260 = vadd.xlane.f32.xlu1 %v259_v6  ;;  %v262_v13 = vadd.f32 %v862_v10, %v860_v9  ;;  %v278_v15 = vmax.f32 %v860_v9, %v862_v10  ;;  %v318_v16 = vld [vmem:[%s939_s1 + $0x18] sm:$0xff]  ;;  %v288_v27 = vadd.s32 4294967288, %v286_v24  ;;  %v292_v30 = vadd.s32 4294967280, %v286_v24  ;;  %v348_v52 = vld [vmem:[%s941_s3] sm:$0xf]  ;;  %s460_s8 = sshll.u32 %s457_s17, 4  ;;  %s461_s8 = int_to_ptr.hbm [resolvable:$true] %s460_s8 }
  0x2e   : > { %339 = vmatpush.msra.mxu0 %v318_v16  ;;  %v296_v35 = vadd.s32 4294967272, %v286_v24  ;;  %544 = vmatpush.msk.msra.mxu1 %vm357_vm5, %v348_v52  ;;  %v608_v53 = vld [vmem:[%s940_s2] ss:$0 sm:$0xff]  ;;  %v419_v59 = vadd.s32 16, %v406_v57  ;;  %v413_v60 = vadd.s32 8, %v406_v57  ;;  %s446_s22 = scalar_lea.sflag [#allocation4], %s832_s12 }
  0x2f   : > { %v609_v58 = vld [vmem:[%s942_s4] ss:$0 sm:$0xff]  ;;  %603 = vset.pattern.permute.xlu2 %v406_v57  ;;  %s658_s14 = sshra.s32 %s461_s8, 4  ;;  %s664_s7 = scalar_lea.hbm %s943_s5, 128  ;;  %s659_s14 = int_to_ptr.hbm [resolvable:$true] %s658_s14 }
  0x30   : > { %340 = vmatpush.msra.mxu0 %v317_v17  ;;  %605 = vset.pattern.permute.xlu1 %v419_v59  ;;  %s660_s28 = scalar_lea.hbm %s659_s14, 64  ;;  %p665_p0 = scmp.lt.s32.totalorder %s659_s14, %s943_s5 }
  0x31   : > { %604 = vset.pattern.permute.xlu0 %v413_v60  ;;  %p661_p6 = scmp.ne.s32.totalorder %s659_s14, %s660_s28  ;;  %p666_p1 = scmp.lt.s32.totalorder %s664_s7, %s660_s28 }
  0x32   : > { %341 = vmatpush.msra.mxu0 %v316_v18 }
  0x33   : > { %p662_p9 = pnand %p661_p6, %p796_p11  ;;  %p667_p3 = por %p666_p1, %p665_p0 }
  0x34   : > { %273 = vmax.xlane.f32.xlu2 %v272_v11  ;;  %257 = vadd.xlane.f32.xlu0 %v256_v12 }
  0x35   : > { %263 = vadd.xlane.f32.xlu1 %v262_v13  ;;  %342 = vmatpush.msra.mxu0 %v315_v19  ;;  %p663_p13 = pneg %p662_p9 }
  0x37   : > { %p668_p4 = pnand %p667_p3, %p663_p13 }
  0x3c   : > { %276 = vmax.xlane.f32.xlu0 %v275_v14 }
  0x3d   : > { %279 = vmax.xlane.f32.xlu1 %v278_v15 }
  0x9f   : > { %v255_v20 = vpop.xlane.xlu0 %254  ;;  %v271_v21 = vpop.xlane.xlu2 %270 }
  0xa0   : > { %v261_v22 = vpop.xlane.xlu1 %260  ;;  %v265_v25 = vmul.f32 0.00390625, %v255_v20  ;;  %v305_v37 = vperm.slane %v271_v21, %v286_v24 }
  0xa1   : > { %v267_v31 = vmul.f32 0.00390625, %v261_v22 }
  0xa2   : > { %v287_v34 = vperm.slane %v265_v25, %v286_v24  ;;  %v425_v24 = vadd.s32 24, %v406_v57 }
  0xa3   : > { %v293_v40 = vperm.slane %v267_v31, %v292_v30 }
  0xa7   : > { %v258_v26 = vpop.xlane.xlu0 %257  ;;  %v274_v32 = vpop.xlane.xlu2 %273 }
  0xa8   : > { %v266_v28 = vmul.f32 0.00390625, %v258_v26  ;;  %v264_v29 = vpop.xlane.xlu1 %263  ;;  %v306_v38 = vperm.slane %v274_v32, %v288_v27 }
  0xa9   : > { %v268_v36 = vmul.f32 0.00390625, %v264_v29 }
  0xaa   : > { %v289_v33 = vperm.slane %v266_v28, %v288_v27  ;;  %v307_v46 = vsel %vm290_vm0, %v306_v38, %v305_v37 }
  0xab   : > { %v297_v41 = vperm.slane %v268_v36, %v296_v35 }
  0xac   : > { %v291_v39 = vsel %vm290_vm0, %v289_v33, %v287_v34 }
  0xad   : > { %v295_v45 = vsel %vm294_vm1, %v293_v40, %v291_v39 }
  0xae   : > { %v299_v49 = vsel %vm298_vm2, %v297_v41, %v295_v45 }
  0xaf   : > { %v277_v42 = vpop.xlane.xlu0 %276 }
  0xb0   : > { %v308_v43 = vperm.slane %v277_v42, %v292_v30  ;;  %v280_v44 = vpop.xlane.xlu1 %279 }
  0xb1   : > { %v310_v47 = vperm.slane %v280_v44, %v296_v35 }
  0xb2   : > { %v309_v48 = vsel %vm294_vm1, %v308_v43, %v307_v46 }
  0xb3   : > { %v311_v50 = vsel %vm298_vm2, %v310_v47, %v309_v48 }
  0xb4   : > { %v314_v51 = vsel %vm313_vm3, %v299_v49, %v311_v50 }
  0xb5   : > { %543 = vmatmul.msk.f32.vlgmr.msra.gmra.mxu0 %vm323_vm4, %v314_v51 }
 0x132   : > { %v344_v54 = vpop.f32.mrf.mxu0 }
 0x133   : > { %v345_v55 = vadd.f32 %v608_v53, %v344_v54 }
 0x135   : > { %v347_v56 = vmax.f32 %v345_v55, 0.0 }
 0x137   : > { %545 = vmatmul.msk.f32.vlgmr.msra.gmra.mxu1 %vm353_vm6, %v347_v56 }
 0x1b4   : > { %v378_v61 = vpop.f32.mrf.mxu1 }
 0x1b5   : > { %v379_v62 = vadd.f32 %v609_v58, %v378_v61 }
 0x1b7   : > { %v382_v63 = vrot.slane %v379_v62, 1 }
 0x1b9   : > { %v384_v3 = vadd.f32 %v382_v63, %v379_v62 }
 0x1bb   : > { %v385_v4 = vsub.f32 0.0, %v384_v3 }
 0x1bd   : > { %v386_v6 = vmul.f32 1.442695, %v385_v4 }
 0x1bf   : > { %610 = vpow2.f32 %v386_v6 }
 0x1c5   : > { %v611_v11 = vpop.eup %610 }
 0x1c6   : > { %v388_v12 = vadd.f32 1.0, %v611_v11 }
 0x1c8   : > { %612 = vrcp.f32 %v388_v12  ;;  %v400_v16 = vand.u32 2147483648, %v388_v12  ;;  %v398_v18 = vand.u32 2147483647, %v388_v12  ;;  %vm394_vm8 = vweird.f32 %v388_v12 }
 0x1ca   : > { %v401_v20 = vor.u32 1.1754944e-38, %v400_v16  ;;  %vm399_vm10 = vcmp.eq.f32.partialorder %v398_v18, 8.507059e+37 }
 0x1ce   : > { %v613_v13 = vpop.eup %612 }
 0x1cf   : > { %v390_v14 = vmul.f32 %v613_v13, %v388_v12  ;;  %vm395_vm7 = vweird.f32 %v613_v13 }
 0x1d0   : > { %vm396_vm9 = vmor %vm394_vm8, %vm395_vm7 }
 0x1d1   : > { %v391_v15 = vsub.f32 1.0, %v390_v14 }
 0x1d3   : > { %v392_v17 = vmul.f32 %v613_v13, %v391_v15 }
 0x1d5   : > { %v393_v19 = vadd.f32 %v613_v13, %v392_v17 }
 0x1d7   : > { %v397_v21 = vsel %vm396_vm9, %v613_v13, %v393_v19 }
 0x1d8   : > { %v402_v22 = vsel %vm399_vm10, %v401_v20, %v397_v21 }
 0x1d9   : > { %v404_v23 = vperm.slane %v402_v22, 0 }
 0x1db   : > { %421 = vperm.xlu1 %605, %v404_v23   ;;  %415 = vperm.xlu0 %604, %v404_v23  }
 0x1dc   : > { %409 = vperm.xlu2 %603, %v404_v23  }
 0x1e3   : > { %607 = vset.pattern.permute.xlu0 %v425_v24 }
 0x1e4   : > { %606 = vset.pattern.permute.xlu2 %v425_v24 }
 0x1ec   : > { %427 = vperm.xlu2 %606, %v404_v23  }
 0x236   : > { %v410_v25 = vpop.permute.xlu2 %409 }
 0x237   : > { %v429_v26 = vmul.f32 %v410_v25, %v842_v0  ;;  %v430_v27 = vmul.f32 %v410_v25, %v844_v1 }
 0x239   : > { %437 = vst [vmem:[%s244_s29] sm:$0xff] %v429_v26 }
 0x23a   : > { %438 = vst [vmem:[%s244_s29 + $0x8] sm:$0xff] %v430_v27 }
 0x246   : > { %v428_v28 = vpop.permute.xlu2 %427 }
 0x247   : > { %v435_v29 = vmul.f32 %v428_v28, %v860_v9  ;;  %v436_v30 = vmul.f32 %v428_v28, %v862_v10 }
 0x249   : > { %443 = vst [vmem:[%s244_s29 + $0x30] sm:$0xff] %v435_v29 }
 0x24a   : > { %444 = vst [vmem:[%s244_s29 + $0x38] sm:$0xff] %v436_v30 }
 0x24d   : > { %v422_v0 = vpop.permute.xlu1 %421  ;;  %v416_v1 = vpop.permute.xlu0 %415 }
 0x24e   : > { %v433_v31 = vmul.f32 %v422_v0, %v846_v2  ;;  %v434_v32 = vmul.f32 %v422_v0, %v852_v5  ;;  %v431_v9 = vmul.f32 %v416_v1, %v856_v7  ;;  %v432_v10 = vmul.f32 %v416_v1, %v858_v8 }
 0x250   : > { %441 = vst [vmem:[%s244_s29 + $0x20] sm:$0xff] %v433_v31 }
 0x251   : > { %442 = vst [vmem:[%s244_s29 + $0x28] sm:$0xff] %v434_v32 }
 0x252   : > { %439 = vst [vmem:[%s244_s29 + $0x10] sm:$0xff] %v431_v9 }
 0x253   : > { %440 = vst [vmem:[%s244_s29 + $0x18] sm:$0xff] %v432_v10 }
 0x254   : > { %671 = shalt.err (!%p668_p4)
}
 0x255   : > { %s714_s12 = smov 256   ;;  %s715_s25 = smov 16  }
 0x256   : > { %555 = dma.vmem_to_hbm [thread:$0]  (%p796_p11), %s459_s26, 1024, %s461_s8, %s446_s22, %s714_s12, %s714_s12, %s715_s25  }
 0x257 PF: > { %s475_s29 = sand.u32 1, %s698_s18   ;;  %p949_p7 = scmp.ge.s32.totalorder %s710_s21, 2 }
 0x258   : > { %s476_s13 = scalar_lea.sflag [#allocation4], %s475_s29 }
 0x259   : > { %p562_p5 = pnand %p949_p7, %p800_p12 }
 0x25b   : > { %p563_p8 = pneg %p562_p5 }
 0x25d   : > { %693 = dma.done.wait (%p563_p8), %s476_s13, 1024  }
 0x25e   : > { %695 = vsyncadd (%p563_p8), %s476_s13, 4294966272  ;;  %p18_p10 = scmp.ge.s32.totalorder %s771_s24, 4   ;;  %s950_s18 = smov %s702_s19 }
 0x25f   : > { %s951_s19 = smov %s706_s20  ;;  %s952_s20 = smov %s783_s27 }
 0x260   : > { %s953_s21 = smov %s771_s24  ;;  %20 = sbr.rel (!%p18_p10) target bundleno = 5 (0x5), region = 85 }
 0x265   :  { %482 = vsyncpa [#allocation3], 1 }
 0x266   :  { %484 = vsyncpa [#allocation3 + $0x1], 1 }
 0x267   :  { %485 = vsyncpa [#allocation4], 1 }
 0x268   :  { %487 = vsyncpa [#allocation4 + $0x1], 1 }

</bundles_post_ra>
